<compile_context>
chip_gen: v7x
topology: tpu7x:2x2x1
jax: 0.10.0
libtpu: 0.0.40
codegen_flags: <defaults>
</compile_context>

<pallas_src>
import jax
import jax.numpy as jnp
from jax import lax
from jax.experimental import pallas as pl
from jax.experimental.pallas import tpu as pltpu


def _round_up(n: int, m: int) -> int:
    return ((n + m - 1) // m) * m


def _cdiv(a: int, b: int) -> int:
    return (a + b - 1) // b


def _vmem_capacity_bytes() -> int:
    """Physical per-core VMEM; falls back to the v7x floor (64 MiB)."""
    try:
        return int(pltpu.get_tpu_info().vmem_capacity_bytes)
    except Exception:
        return 64 * 1024 * 1024


def gated_fusion_kernel(x_ref, y_ref, wt_ref, b_ref, o_ref):
    """Computes one (TM, TN) output tile.

    x_ref : (TM, Dp)  activation rows (full feature width; resident across N)
    y_ref : (TM, TN)
    wt_ref: (Dp, TN)  bf16 weight already in canonical (K, N) layout (== W^T)
    b_ref : (1,  TN)  f32 bias
    o_ref : (TM, TN)
    """
    tn = o_ref.shape[-1]
    dp = x_ref.shape[-1]

    x_full = x_ref[...]

    # gate = sigmoid(x @ W^T + b) — plain (M,K)x(K,N) MXU matmul, bf16
    # operands, f32 accumulation; sigmoid runs on the EUP in f32.
    z = lax.dot_general(
        x_full.astype(jnp.bfloat16), wt_ref[...],
        dimension_numbers=(((1,), (0,)), ((), ())),
        preferred_element_type=jnp.float32)
    gate = jax.nn.sigmoid(z + b_ref[...])

    if tn == dp:
        xs = x_full                                  # common case: no N tiling
    else:
        start = pl.multiple_of(pl.program_id(1) * tn, 128)
        xs = x_ref[:, pl.ds(start, tn)]              # matching x columns

    xf = xs.astype(jnp.float32)
    yf = y_ref[...].astype(jnp.float32)
    out = xf + gate * (yf - xf)                      # == gate*y + (1-gate)*x
    o_ref[...] = out.astype(o_ref.dtype)


def prepare_gate_params(w, b, d_padded=None):
    """Transpose + cast + (optionally) pad the gate Linear parameters once.

    w: (D, D) in nn.Linear (out, in) layout; b: (D,).
    Returns (wt, bias2d): wt is (Dp, Dp) bf16 in (in, out) == (K, N) layout,
    bias2d is (1, Dp) f32.  Call once at init when the layer is reused.
    """
    D = w.shape[0]
    Dp = d_padded if d_padded is not None else max(128, _round_up(D, 128))
    wt = w.T.astype(jnp.bfloat16)
    b2 = b.astype(jnp.float32).reshape(1, D)
    if Dp != D:
        wt = jnp.zeros((Dp, Dp), jnp.bfloat16).at[:D, :D].set(wt)
        b2 = jnp.zeros((1, Dp), jnp.float32).at[:, :D].set(b2)
    return wt, b2


def _pick_tm(B: int, tm_default: int) -> int:
    tm_default = max(8, (tm_default // 8) * 8)
    if B <= tm_default:
        return B                       # single batch tile == full batch dim
    n = _cdiv(B, tm_default)           # balance tiles so the tail isn't tiny
    return min(tm_default, _round_up(_cdiv(B, n), 8))


def gated_fusion(x, y, w, b, *, tm=256, tn=None, params_prepared=False):
    """out = sigmoid(x @ w.T + b) * y + (1 - sigmoid(...)) * x.

    x, y: (B, D).  w: (D, D) nn.Linear (out, in) layout, b: (D,), unless
    params_prepared=True in which case (w, b) must come from
    prepare_gate_params (recommended for repeatedly-called layers).
    """
    B, D = x.shape
    assert y.shape == (B, D), (x.shape, y.shape)
    assert x.dtype == y.dtype

    Dp = max(128, _round_up(D, 128))

    if params_prepared:
        wt, b2 = w, b
        assert wt.shape == (Dp, Dp) and b2.shape == (1, Dp)
    else:
        assert w.shape == (D, D) and b.shape == (D,)
        wt, b2 = prepare_gate_params(w, b, Dp)

    # Feature padding only when D is not lane-aligned; never pad the batch.
    if Dp != D:
        xk = jnp.zeros((B, Dp), x.dtype).at[:, :D].set(x)
        yk = jnp.zeros((B, Dp), y.dtype).at[:, :D].set(y)
    else:
        xk, yk = x, y

    cap = _vmem_capacity_bytes()

    # N (output-feature) tiling only when the whole bf16 weight would not
    # comfortably fit VMEM-resident.
    if tn is not None:
        TN = min(Dp, max(128, (tn // 128) * 128))
    elif Dp * Dp * 2 <= cap // 3:
        TN = Dp
    else:
        per_buf = cap // 6             # weight gets double-buffered when tiled
        TN = max(128, min(Dp, (per_buf // (Dp * 2) // 128) * 128))
    n_j = _cdiv(Dp, TN)

    TM = _pick_tm(B, tm)
    n_i = _cdiv(B, TM)
    # Prefer >= 2 grid steps so both v7x TensorCores get work.
    if n_i == 1 and n_j == 1 and B >= 16 and B % 16 == 0:
        TM = B // 2
        n_i = 2

    grid = (n_i, n_j)
    single_buffer_w = (n_j == 1)       # constant weight block -> VMEM-resident

    isz = jnp.dtype(x.dtype).itemsize
    cost = pl.CostEstimate(
        flops=2 * B * Dp * Dp,
        transcendentals=B * Dp,                               # sigmoid
        bytes_accessed=3 * B * Dp * isz + Dp * Dp * 2 + Dp * 4,
    )

    def build_and_call(single_buffer_weight):
        w_bufs = 1 if single_buffer_weight else 2
        vmem_need = (
            w_bufs * Dp * TN * 2                    # bf16 weight buffer(s)
            + w_bufs * TN * 4                       # bias buffer(s)
            + 2 * TM * Dp * isz                     # x tiles (double-buffered)
            + 2 * TM * TN * isz                     # y tiles
            + 2 * TM * TN * isz                     # out tiles
            + TM * Dp * 2                           # bf16 copy of x for MXU
            + 4 * TM * TN * 4                       # z/gate, xf, yf, out (f32)
            + (2 << 20))                            # headroom
        vmem_limit = min(max(vmem_need, 32 << 20), cap)

        if single_buffer_weight:
            w_spec = pl.BlockSpec((Dp, TN), lambda i, j: (0, j),
                                  pipeline_mode=pl.Buffered(1))
            b_spec = pl.BlockSpec((1, TN), lambda i, j: (0, j),
                                  pipeline_mode=pl.Buffered(1))
        else:
            w_spec = pl.BlockSpec((Dp, TN), lambda i, j: (0, j))
            b_spec = pl.BlockSpec((1, TN), lambda i, j: (0, j))

        return pl.pallas_call(
            gated_fusion_kernel,
            out_shape=jax.ShapeDtypeStruct((B, Dp), x.dtype),
            grid_spec=pltpu.PrefetchScalarGridSpec(
                num_scalar_prefetch=0,
                grid=grid,
                in_specs=[
                    pl.BlockSpec((TM, Dp), lambda i, j: (i, 0)),  # x rows
                    pl.BlockSpec((TM, TN), lambda i, j: (i, j)),  # y tile
                    w_spec,                                       # weight
                    b_spec,                                       # bias
                ],
                out_specs=pl.BlockSpec((TM, TN), lambda i, j: (i, j)),
            ),
            compiler_params=pltpu.CompilerParams(
                dimension_semantics=("parallel", "arbitrary"),
                vmem_limit_bytes=vmem_limit,
            ),
            cost_estimate=cost,
        )(xk, yk, wt, b2)

    try:
        out = build_and_call(single_buffer_w)
    except Exception:
        if not single_buffer_w:
            raise
        # pipeline_mode=pl.Buffered(1) not supported on this jax version:
        # fall back to default (double-buffered) weight/bias specs.
        out = build_and_call(False)

    return out if Dp == D else out[:, :D]


def _reference(x, y, w, b):
    gate = jax.nn.sigmoid(x @ w.T + b)
    return gate * y + (1.0 - gate) * x


if __name__ == "__main__":
    key = jax.random.PRNGKey(0)

    def make_case(k, B, D):
        kx, ky, kw, kb = jax.random.split(k, 4)
        x = jax.random.normal(kx, (B, D), dtype=jnp.float32)
        y = jax.random.normal(ky, (B, D), dtype=jnp.float32)
        bound = 1.0 / (D ** 0.5)      # nn.Linear default init range
        w = jax.random.uniform(kw, (D, D), minval=-bound, maxval=bound,
                               dtype=jnp.float32)
        b = jax.random.uniform(kb, (D,), minval=-bound, maxval=bound,
                               dtype=jnp.float32)
        return x, y, w, b

    # (B, D, tn): aligned fast path (no pads), feature-padded + unaligned
    # batch path, and the N-tiled path.
    cases = [
        (16, 128, None),
        (20, 96, None),
        (40, 256, 128),
    ]
    k = key
    for (B, D, tn) in cases:
        k, sub = jax.random.split(k)
        x, y, w, b = make_case(sub, B, D)
        out = jax.block_until_ready(gated_fusion(x, y, w, b, tn=tn))
        ref = _reference(x, y, w, b)
        assert out.shape == ref.shape, (out.shape, ref.shape)
        # bf16 MXU operands -> slightly loosened tolerance vs the f32 reference.
        assert jnp.allclose(out, ref, atol=2e-2, rtol=2e-2), (
            f"mismatch vs reference for B={B}, D={D}, tn={tn}")

    print("KERNEL_OK")
</pallas_src>

<mosaic_0001>
module attributes {stable_mosaic.version = 11 : i64} {
  func.func @gated_fusion_kernel(%arg0: i32, %arg1: i32, %arg2: memref<8x128xf32, #tpu.memory_space<vmem>>, %arg3: memref<8x128xf32, #tpu.memory_space<vmem>>, %arg4: memref<128x128xbf16, #tpu.memory_space<vmem>>, %arg5: memref<1x128xf32, #tpu.memory_space<vmem>>, %arg6: memref<8x128xf32, #tpu.memory_space<vmem>>) attributes {dimension_semantics = [#tpu.dimension_semantics<parallel>, #tpu.dimension_semantics<arbitrary>], iteration_bounds = array<i64: 2, 1>, scalar_prefetch = 0 : i64, scratch_operands = 0 : i64, tpu.core_type = #tpu.core_type<tc>, window_params = [{transform_indices = @transform_0, window_bounds = array<i64: 8, 128>}, {transform_indices = @transform_1, window_bounds = array<i64: 8, 128>}, {pipeline_mode = #tpu.pipeline_mode<synchronous>, transform_indices = @transform_2, window_bounds = array<i64: 128, 128>}, {pipeline_mode = #tpu.pipeline_mode<synchronous>, transform_indices = @transform_3, window_bounds = array<i64: 1, 128>}, {transform_indices = @transform_4, window_bounds = array<i64: 8, 128>}]} {
    %c0 = arith.constant 0 : index
    %c0_0 = arith.constant 0 : index
    %0 = vector.load %arg2[%c0, %c0_0] : memref<8x128xf32, #tpu.memory_space<vmem>>, vector<8x128xf32>
    %1 = arith.truncf %0 : vector<8x128xf32> to vector<8x128xbf16>
    %c0_1 = arith.constant 0 : index
    %c0_2 = arith.constant 0 : index
    %2 = vector.load %arg4[%c0_1, %c0_2] : memref<128x128xbf16, #tpu.memory_space<vmem>>, vector<128x128xbf16>
    %cst = arith.constant dense<0.000000e+00> : vector<8x128xf32>
    %3 = tpu.matmul %1, %2, %cst {dimension_numbers = #tpu.dot_dimension_numbers<[1], [0], [0], [1], [0, 0, 1, 1], [], []>} : vector<8x128xbf16>, vector<128x128xbf16>, vector<8x128xf32> -> vector<8x128xf32>
    %c0_3 = arith.constant 0 : index
    %c0_4 = arith.constant 0 : index
    %4 = vector.load %arg5[%c0_3, %c0_4] : memref<1x128xf32, #tpu.memory_space<vmem>>, vector<1x128xf32>
    %5 = vector.broadcast %4 : vector<1x128xf32> to vector<8x128xf32>
    %6 = arith.addf %3, %5 : vector<8x128xf32>
    %7 = arith.negf %6 : vector<8x128xf32>
    %8 = math.exp %7 : vector<8x128xf32>
    %cst_5 = arith.constant 1.000000e+00 : f32
    %9 = vector.broadcast %cst_5 : f32 to vector<8x128xf32>
    %10 = arith.addf %9, %8 : vector<8x128xf32>
    %11 = arith.divf %9, %10 : vector<8x128xf32>
    %c0_6 = arith.constant 0 : index
    %c0_7 = arith.constant 0 : index
    %12 = vector.load %arg3[%c0_6, %c0_7] : memref<8x128xf32, #tpu.memory_space<vmem>>, vector<8x128xf32>
    %13 = arith.subf %12, %0 : vector<8x128xf32>
    %14 = arith.mulf %11, %13 : vector<8x128xf32>
    %15 = arith.addf %0, %14 : vector<8x128xf32>
    %c0_8 = arith.constant 0 : index
    %c0_9 = arith.constant 0 : index
    %16 = vector.load %arg6[%c0_8, %c0_9] : memref<8x128xf32, #tpu.memory_space<vmem>>, vector<8x128xf32>
    tpu.vector_store %arg6[%c0_8, %c0_9], %15 {strides = array<i32>} : memref<8x128xf32, #tpu.memory_space<vmem>>, vector<8x128xf32>,
    return
  }
  func.func @transform_0(%arg0: i32, %arg1: i32) -> (i32, i32) {
    %c0_i32 = arith.constant 0 : i32
    %c0_i32_0 = arith.constant 0 : i32
    return %arg0, %c0_i32 : i32, i32
  }
  func.func @transform_1(%arg0: i32, %arg1: i32) -> (i32, i32) {
    %c0_i32 = arith.constant 0 : i32
    return %arg0, %arg1 : i32, i32
  }
  func.func @transform_2(%arg0: i32, %arg1: i32) -> (i32, i32) {
    %c0_i32 = arith.constant 0 : i32
    %c0_i32_0 = arith.constant 0 : i32
    return %c0_i32, %arg1 : i32, i32
  }
  func.func @transform_3(%arg0: i32, %arg1: i32) -> (i32, i32) {
    %c0_i32 = arith.constant 0 : i32
    %c0_i32_0 = arith.constant 0 : i32
    return %c0_i32, %arg1 : i32, i32
  }
  func.func @transform_4(%arg0: i32, %arg1: i32) -> (i32, i32) {
    %c0_i32 = arith.constant 0 : i32
    return %arg0, %arg1 : i32, i32
  }
}

module attributes {stable_mosaic.version = 11 : i64} {
  func.func @gated_fusion_kernel(%arg0: i32, %arg1: i32, %arg2: memref<8x128xf32, #tpu.memory_space<vmem>>, %arg3: memref<8x128xf32, #tpu.memory_space<vmem>>, %arg4: memref<128x128xbf16, #tpu.memory_space<vmem>>, %arg5: memref<1x128xf32, #tpu.memory_space<vmem>>, %arg6: memref<8x128xf32, #tpu.memory_space<vmem>>) attributes {dimension_semantics = [#tpu.dimension_semantics<parallel>, #tpu.dimension_semantics<arbitrary>], iteration_bounds = array<i64: 2, 1>, scalar_prefetch = 0 : i64, scratch_operands = 0 : i64, tpu.core_type = #tpu.core_type<tc>, window_params = [{transform_indices = @transform_0, window_bounds = array<i64: 8, 128>}, {transform_indices = @transform_1, window_bounds = array<i64: 8, 128>}, {transform_indices = @transform_2, window_bounds = array<i64: 128, 128>}, {transform_indices = @transform_3, window_bounds = array<i64: 1, 128>}, {transform_indices = @transform_4, window_bounds = array<i64: 8, 128>}]} {
    %c0 = arith.constant 0 : index
    %c0_0 = arith.constant 0 : index
    %0 = vector.load %arg2[%c0, %c0_0] : memref<8x128xf32, #tpu.memory_space<vmem>>, vector<8x128xf32>
    %1 = arith.truncf %0 : vector<8x128xf32> to vector<8x128xbf16>
    %c0_1 = arith.constant 0 : index
    %c0_2 = arith.constant 0 : index
    %2 = vector.load %arg4[%c0_1, %c0_2] : memref<128x128xbf16, #tpu.memory_space<vmem>>, vector<128x128xbf16>
    %cst = arith.constant dense<0.000000e+00> : vector<8x128xf32>
    %3 = tpu.matmul %1, %2, %cst {dimension_numbers = #tpu.dot_dimension_numbers<[1], [0], [0], [1], [0, 0, 1, 1], [], []>} : vector<8x128xbf16>, vector<128x128xbf16>, vector<8x128xf32> -> vector<8x128xf32>
    %c0_3 = arith.constant 0 : index
    %c0_4 = arith.constant 0 : index
    %4 = vector.load %arg5[%c0_3, %c0_4] : memref<1x128xf32, #tpu.memory_space<vmem>>, vector<1x128xf32>
    %5 = vector.broadcast %4 : vector<1x128xf32> to vector<8x128xf32>
    %6 = arith.addf %3, %5 : vector<8x128xf32>
    %7 = arith.negf %6 : vector<8x128xf32>
    %8 = math.exp %7 : vector<8x128xf32>
    %cst_5 = arith.constant 1.000000e+00 : f32
    %9 = vector.broadcast %cst_5 : f32 to vector<8x128xf32>
    %10 = arith.addf %9, %8 : vector<8x128xf32>
    %11 = arith.divf %9, %10 : vector<8x128xf32>
    %c0_6 = arith.constant 0 : index
    %c0_7 = arith.constant 0 : index
    %12 = vector.load %arg3[%c0_6, %c0_7] : memref<8x128xf32, #tpu.memory_space<vmem>>, vector<8x128xf32>
    %13 = arith.subf %12, %0 : vector<8x128xf32>
    %14 = arith.mulf %11, %13 : vector<8x128xf32>
    %15 = arith.addf %0, %14 : vector<8x128xf32>
    %c0_8 = arith.constant 0 : index
    %c0_9 = arith.constant 0 : index
    %16 = vector.load %arg6[%c0_8, %c0_9] : memref<8x128xf32, #tpu.memory_space<vmem>>, vector<8x128xf32>
    tpu.vector_store %arg6[%c0_8, %c0_9], %15 {strides = array<i32>} : memref<8x128xf32, #tpu.memory_space<vmem>>, vector<8x128xf32>,
    return
  }
  func.func @transform_0(%arg0: i32, %arg1: i32) -> (i32, i32) {
    %c0_i32 = arith.constant 0 : i32
    %c0_i32_0 = arith.constant 0 : i32
    return %arg0, %c0_i32 : i32, i32
  }
  func.func @transform_1(%arg0: i32, %arg1: i32) -> (i32, i32) {
    %c0_i32 = arith.constant 0 : i32
    return %arg0, %arg1 : i32, i32
  }
  func.func @transform_2(%arg0: i32, %arg1: i32) -> (i32, i32) {
    %c0_i32 = arith.constant 0 : i32
    %c0_i32_0 = arith.constant 0 : i32
    return %c0_i32, %arg1 : i32, i32
  }
  func.func @transform_3(%arg0: i32, %arg1: i32) -> (i32, i32) {
    %c0_i32 = arith.constant 0 : i32
    %c0_i32_0 = arith.constant 0 : i32
    return %c0_i32, %arg1 : i32, i32
  }
  func.func @transform_4(%arg0: i32, %arg1: i32) -> (i32, i32) {
    %c0_i32 = arith.constant 0 : i32
    return %arg0, %arg1 : i32, i32
  }
}

</mosaic_0001>

<bundles_post_ra>
// kernel: tpu_custom_call.1
= control target key start
LH: loop header
LB: loop body
LE: loop exit
PB: predicated region body
PF: predicated region fallthrough
CT: control target
= control target key end

     0   :  { %s1191_s0 = inlined_call_operand.hbm [shape: f32[16,128], index: 0, kind: input, shape index: {}]   ;;  %s1192_s1 = inlined_call_operand.hbm [shape: f32[16,128], index: 1, kind: input, shape index: {}]   ;;  %s1193_s2 = inlined_call_operand.hbm [shape: bf16[128,128], index: 2, kind: input, shape index: {}]   ;;  %s1194_s3 = inlined_call_operand.vmem [shape: f32[1,128], index: 3, kind: input, shape index: {}]   ;;  %s1195_s4 = inlined_call_operand.hbm [shape: f32[16,128], index: 4, kind: output, shape index: {}]  }
   0x1   :  { %1202 = sst [smem:[#allocation15_spill]] %s1193_s2 }
   0x2   :  { %9 = vsyncpa [#allocation3], 0 }
   0x3   :  { %11 = vsyncpa [#allocation3 + $0x1], 0 }
   0x4   :  { %12 = vsyncpa [#allocation6], 0 }
   0x5   :  { %14 = vsyncpa [#allocation6 + $0x1], 0 }
   0x6   :  { %15 = vsyncpa [#allocation4], 0 }
   0x7   :  { %17 = vsyncpa [#allocation4 + $0x1], 0  ;;  %s933_s15 = smov 0   ;;  %s935_s16 = smov 0  }
   0x8   :  { %s937_s17 = smov 0   ;;  %s939_s18 = smov 0  }
   0x9   :  { %s941_s19 = smov 0   ;;  %s943_s20 = smov 0  }
   0xa LB: > { %1203 = sst [smem:[#allocation13_spill]] %s894_s19  ;;  %s964_s21 = sadd.s32 4294967295, %s898_s20   ;;  %s898_s20 = sphi %s943_s20, %s23_s20   ;;  %s894_s19 = sphi %s941_s19, %s1222_s19   ;;  %s890_s18 = sphi %s939_s18, %s1221_s18   ;;  %s886_s17 = sphi %s937_s17, %s1225_s17   ;;  %s882_s16 = sphi %s935_s16, %s1224_s16   ;;  %s878_s15 = sphi %s933_s15, %s1223_s15  }
   0xb   : > { %s569_s22 = sadd.s32 4294967294, %s898_s20   ;;  %p55_p0 = scmp.ne.s32.totalorder %s882_s16, %s878_s15 }
   0xc   : > { %p1196_p1 = scmp.eq.s32.totalorder %s964_s21, 0  ;;  %p167_p3 = scmp.eq.s32.totalorder %s569_s22, 1 }
   0xd   : > { %p570_p5 = scmp.ge.s32.totalorder %s898_s20, 1  ;;  %p174_p7 = scmp.lt.s32.totalorder %s898_s20, 3 }
   0xe   : > { %p973_p4 = por %p1196_p1, %p55_p0  ;;  %p978_p6 = por %p167_p3, %p55_p0 }
   0xf   : > { %p983_p8 = pnand %p570_p5, %p174_p7  ;;  %s900_s26 = smov [#allocation7]  }
  0x10   : > { %s1204_s23 = scalar_select %p973_p4, 1, 0 }
  0x11   : > { %s1205_s24 = scalar_select %p978_p6, 1, 0 }
  0x12   : > { %s1206_s25 = scalar_select %p983_p8, 1, 0 }
  0x13   : > { %s188_s27 = sshll.u32 %s900_s26, 4  ;;  %p636_p9 = pneg %p983_p8  ;;  %s189_s27 = int_to_ptr.vmem [resolvable:$true] %s188_s27 }
  0x14   : > { %s35_s29 = sadd.s32 1, %s894_s19  ;;  %s1208_s2 = sld [smem:[#allocation15_spill]] }
  0x15   : > { %p992_p11 = pnand %p636_p9, %p1196_p1 }
  0x17   : > { %p722_p13 = pneg %p992_p11 }
  0x1a   : > { %s720_s6 = scalar_lea.hbm %s1208_s2, 1024 }
  0x1b   : > { %p721_p12 = scmp.ne.s32.totalorder %s1208_s2, %s720_s6  ;;  %p727_p5 = scmp.lt.u32.totalorder %s720_s6, %s1208_s2 }
  0x1d   : > { %p723_p0 = pnand %p722_p13, %p721_p12 }
  0x1f   : > { %p724_p3 = pneg %p723_p0 }
  0x21   : > { %p729_p7 = pnand %p727_p5, %p724_p3 }
  0x23   : > { %732 = shalt.err (!%p729_p7)
}
  0x24   : > { %s733_s11 = scalar_lea.vmem %s189_s27, 1024  ;;  %p741_p2 = scmp.lt.s32.totalorder %s189_s27, %s189_s27 }
  0x25   : > { %p734_p9 = scmp.ne.s32.totalorder %s189_s27, %s733_s11  ;;  %p742_p6 = scmp.lt.s32.totalorder %s733_s11, %s733_s11 }
  0x27   : > { %p736_p10 = pnand %p734_p9, %p722_p13  ;;  %p743_p4 = por %p742_p6, %p741_p2 }
  0x29   : > { %p737_p1 = pneg %p736_p10 }
  0x2b   : > { %p744_p8 = pnand %p743_p4, %p737_p1 }
  0x2d   : > { %747 = shalt.err (!%p744_p8)
}
  0x2e   : > { %s901_s12 = smov 64   ;;  %s902_s13 = smov 4  }
  0x2f   : > { %639 = dma.hbm_to_vmem [thread:$0]  (!%p992_p11), %s1208_s2, 1024, %s189_s27, [#allocation6], %s901_s12, %s901_s12, %s902_s13  }
  0x30   : > { %p37_p1 = scmp.ge.s32.totalorder %s35_s29, 2  ;;  %s42_s26 = sadd.s32 1, %s886_s17 }
  0x31   : > { %p49_p2 = scmp.ne.s32.totalorder %s886_s17, %s882_s16  ;;  %p50_p4 = scmp.eq.s32.totalorder %s898_s20, 0 }
  0x32   : > { %s1227_s29 = smov (%p37_p1, %s35_s29), 0  ;;  %p1211_p8 = scmp.eq.s32.totalorder %s964_s21, 1 }
  0x33   : > { %1209 = sst [smem:[#allocation14_spill]] %s1227_s29  ;;  %p1019_p6 = por %p50_p4, %p49_p2 }
  0x34   : > { %p1025_p10 = por %p1211_p8, %p49_p2  ;;  %s39_s5 = ssub.s32 %s894_s19, %s1227_s29 }
  0x35   : > { %p652_p11 = scmp.lt.s32.totalorder %s898_s20, 2  ;;  %p40_p12 = scmp.eq.s32.totalorder %s39_s5, 0 }
  0x36   : > { %s1212_s28 = scalar_select %p1025_p10, 1, 0 }
  0x37   : > { %s208_s27 = sand.u32 1, %s886_s17   ;;  %s575_s8 = sshll.u32 %s894_s19, 7 }
  0x38   : > { %s1033_s6 = sshll.u32 %s208_s27, 3  ;;  %s1042_s11 = scalar_lea.hbm %s1191_s0, %s575_s8 }
  0x39   : > { %s1036_s7 = scalar_select %p40_p12, %s886_s17, %s42_s26  }
  0x3a   : > { %s212_s12 = scalar_lea.vmem [#allocation2], %s1033_s6  ;;  %p1049_p13 = pnand %p652_p11, %p1019_p6 }
  0x3b   : > { %s219_s13 = sshll.u32 %s212_s12, 4  ;;  %s1056_s5 = scalar_lea.hbm %s1192_s1, %s575_s8  ;;  %s1045_s13 = int_to_ptr.vmem [resolvable:$true] %s219_s13 }
  0x3c   : > { %s226_s9 = sand.u32 1, %s898_s20   ;;  %s209_s10 = scalar_lea.sflag [#allocation3], %s208_s27 }
  0x3d   : > { %s748_s2 = scalar_lea.hbm %s1042_s11, 128  ;;  %p750_p3 = pneg %p1049_p13 }
  0x3e   : > { %p749_p0 = scmp.ne.s32.totalorder %s1042_s11, %s748_s2  ;;  %s753_s29 = scalar_lea.hbm %s1191_s0, 256 }
  0x3f   : > { %p754_p9 = scmp.lt.u32.totalorder %s1042_s11, %s1191_s0  ;;  %p755_p1 = scmp.lt.u32.totalorder %s753_s29, %s748_s2 }
  0x40   : > { %p751_p5 = pnand %p750_p3, %p749_p0  ;;  %p757_p4 = scmp.lt.u32.totalorder %s748_s2, %s1042_s11 }
  0x41   : > { %p756_p2 = por %p755_p1, %p754_p9 }
  0x42   : > { %p752_p7 = pneg %p751_p5 }
  0x43   : > { %p758_p6 = por %p757_p4, %p756_p2 }
  0x45   : > { %p759_p8 = pnand %p758_p6, %p752_p7 }
  0x47   : > { %762 = shalt.err (!%p759_p8)
}
  0x48   : > { %s763_s27 = scalar_lea.vmem %s1045_s13, 128  ;;  %s903_s8 = smov [#allocation2]  }
  0x49   : > { %p764_p11 = scmp.ne.s32.totalorder %s1045_s13, %s763_s27  ;;  %s768_s26 = sshll.u32 %s903_s8, 4  ;;  %s769_s26 = int_to_ptr.vmem [resolvable:$false] %s768_s26 }
  0x4a   : > { %s770_s19 = scalar_lea.vmem %s769_s26, 256  ;;  %p771_p5 = scmp.lt.s32.totalorder %s1045_s13, %s769_s26 }
  0x4b   : > { %p766_p12 = pnand %p764_p11, %p750_p3  ;;  %p772_p9 = scmp.lt.s32.totalorder %s770_s19, %s763_s27 }
  0x4d   : > { %p767_p0 = pneg %p766_p12  ;;  %p773_p1 = por %p772_p9, %p771_p5 }
  0x4f   : > { %p774_p2 = pnand %p773_p1, %p767_p0 }
  0x51   : > { %777 = shalt.err (!%p774_p2)
}
  0x52   : > { %643 = dma.hbm_to_vmem [thread:$0]  (!%p1049_p13), %s1042_s11, 128, %s1045_s13, %s209_s10  }
  0x53   : > { %s230_s2 = scalar_lea.vmem [#allocation5], %s1033_s6  ;;  %s227_s30 = scalar_lea.sflag [#allocation6], %s226_s9 }
  0x54   : > { %s238_s29 = sshll.u32 %s230_s2, 4  ;;  %s778_s12 = scalar_lea.hbm %s1056_s5, 128  ;;  %s239_s29 = int_to_ptr.vmem [resolvable:$true] %s238_s29 }
  0x55   : > { %p779_p7 = scmp.ne.s32.totalorder %s1056_s5, %s778_s12  ;;  %s783_s8 = scalar_lea.hbm %s1192_s1, 256 }
  0x56   : > { %p784_p8 = scmp.lt.u32.totalorder %s1056_s5, %s1192_s1  ;;  %p785_p11 = scmp.lt.u32.totalorder %s783_s8, %s778_s12 }
  0x57   : > { %p781_p4 = pnand %p779_p7, %p750_p3  ;;  %p787_p0 = scmp.lt.u32.totalorder %s778_s12, %s1056_s5 }
  0x58   : > { %p786_p12 = por %p785_p11, %p784_p8 }
  0x59   : > { %p782_p6 = pneg %p781_p4 }
  0x5a   : > { %p788_p5 = por %p787_p0, %p786_p12 }
  0x5c   : > { %p789_p9 = pnand %p788_p5, %p782_p6 }
  0x5e   : > { %792 = shalt.err (!%p789_p9)
}
  0x5f   : > { %s793_s6 = scalar_lea.vmem %s239_s29, 128  ;;  %s904_s11 = smov [#allocation5]  }
  0x60   : > { %p794_p1 = scmp.ne.s32.totalorder %s239_s29, %s793_s6  ;;  %s798_s13 = sshll.u32 %s904_s11, 4  ;;  %s799_s13 = int_to_ptr.vmem [resolvable:$false] %s798_s13 }
  0x61   : > { %s800_s9 = scalar_lea.vmem %s799_s13, 256  ;;  %p801_p4 = scmp.lt.s32.totalorder %s239_s29, %s799_s13 }
  0x62   : > { %p796_p2 = pnand %p794_p1, %p750_p3  ;;  %p802_p10 = scmp.lt.s32.totalorder %s800_s9, %s793_s6 }
  0x64   : > { %p797_p7 = pneg %p796_p2  ;;  %p803_p8 = por %p802_p10, %p801_p4 }
  0x66   : > { %p804_p11 = pnand %p803_p8, %p797_p7 }
  0x68   : > { %807 = shalt.err (!%p804_p11)
}
  0x69   : > { %646 = dma.hbm_to_vmem [thread:$0]  (!%p1049_p13), %s1056_s5, 128, %s239_s29, %s227_s30  }
  0x6a   : > { %p1214_p6 = scmp.ne.s32.totalorder %s1206_s25, 0 }
  0x6b   : > { %s1109_s10 = sand.u32 (!%p1214_p6), 1, %s882_s16   ;;  %p1215_p10 = scmp.ne.s32.totalorder (!%p1214_p6), %s1204_s23, 0 }
  0x6c   : > { %247 = sbr.rel (%p1214_p6) target bundleno = 413 (0x19d), region = 36  ;;  %s1112_s2 = sshll.u32 (!%p1214_p6), %s1109_s10, 3 }
  0x6d   : > { %s250_s12 = scalar_lea.sflag (!%p1214_p6), [#allocation3], %s1109_s10  ;;  %s253_s22 = scalar_lea.vmem (!%p1214_p6), [#allocation2], %s1112_s2 }
  0x73   : > { %861 = dma.done.wait (%p1215_p10), %s250_s12, 128  }
  0x74   : > { %863 = vsyncadd (%p1215_p10), %s250_s12, 4294967168  ;;  %s258_s25 = sand.u32 1, %s964_s21   ;;  %s262_s5 = scalar_lea.vmem [#allocation5], %s1112_s2 }
  0x75   : > { %s259_s14 = scalar_lea.sflag [#allocation6], %s258_s25 }
  0x76   : > { %865 = dma.done.wait (%p1215_p10), %s259_s14, 128  }
  0x77   : > { %867 = vsyncadd (%p1215_p10), %s259_s14, 4294967168  ;;  %p1216_p13 = scmp.eq.s32.totalorder %s964_s21, 0 }
  0x79   : > { %869 = dma.done.wait (%p1216_p13), [#allocation6], 1024   ;;  %p1217_p3 = pmov %p1216_p13 }
  0x7a   : > { %v905_v0 = vmov 0.0   ;;  %vm906_vm0 = vmmov 0   ;;  %v708_v1 = vld [vmem:[#allocation7] sm:$0xff]   ;;  %v709_v2 = vld [vmem:[#allocation7 + $0x8] sm:$0xff]   ;;  %v710_v3 = vld [vmem:[#allocation7 + $0x10] sm:$0xff]   ;;  %s594_s29 = sshll.u32 %s890_s18, 7 }
  0x7b   : > { %871 = vsyncadd (%p1217_p3), [#allocation6], 4294966272  ;;  %606 = vmatprep.subr.bf16.mxu0 %v905_v0  ;;  %622 = vmatprep.mubr.msk.bf16.mxu0 %vm906_vm0, %v905_v0  ;;  %v711_v4 = vld [vmem:[#allocation7 + $0x18] sm:$0xff]   ;;  %v712_v5 = vld [vmem:[#allocation7 + $0x20] sm:$0xff]   ;;  %s298_s30 = scalar_lea.vmem [#allocation8], %s1112_s2  ;;  %s1142_s19 = scalar_lea.hbm %s1195_s4, %s594_s29 }
  0x7c   : > { %607 = vmatpush3.bf16.msra.mxu0 %v708_v1  ;;  %v713_v6 = vld [vmem:[#allocation7 + $0x28] sm:$0xff]   ;;  %v714_v7 = vld [vmem:[#allocation7 + $0x30] sm:$0xff]   ;;  %v715_v8 = vld [vmem:[#allocation7 + $0x38] sm:$0xff]   ;;  %s442_s27 = sshll.u32 %s298_s30, 4  ;;  %s428_s6 = scalar_lea.sflag [#allocation4], %s1109_s10  ;;  %s1144_s27 = int_to_ptr.vmem [resolvable:$true] %s442_s27 }
  0x7d   : > { %608 = vmatprep.subr.bf16.mxu0 %v905_v0  ;;  %v303_v9 = vld [vmem:[%s253_s22] sm:$0xff]  ;;  %v422_v20 = vld [vmem:[%s262_s5] sm:$0xff]  ;;  %s808_s11 = scalar_lea.vmem %s1144_s27, 128  ;;  %p1218_p0 = scmp.ne.s32.totalorder %s1212_s28, 0 }
  0x7e   : > { %v304_v10 = vpack.c.bf16 %v303_v9, %v303_v9  ;;  %v583_v11 = vld [vmem:[%s1194_s3] ss:$0 sm:$0xff]  ;;  %v423_v21 = vsub.f32 %v422_v20, %v303_v9  ;;  %p809_p12 = scmp.ne.s32.totalorder %s1144_s27, %s808_s11  ;;  %s907_s18 = smov [#allocation8]  }
  0x7f   : > { %s812_s13 = sshll.u32 %s907_s18, 4  ;;  %s813_s13 = int_to_ptr.vmem [resolvable:$false] %s812_s13 }
  0x80   : > { %609 = vmatpush3.bf16.msra.mxu0 %v709_v2  ;;  %p810_p5 = pnand %p809_p12, %p1218_p0  ;;  %s814_s9 = scalar_lea.vmem %s813_s13, 256 }
  0x81   : > { %610 = vmatprep.subr.bf16.mxu0 %v905_v0  ;;  %p815_p1 = scmp.lt.s32.totalorder %s1144_s27, %s813_s13  ;;  %p816_p2 = scmp.lt.s32.totalorder %s814_s9, %s808_s11 }
  0x82   : > { %p811_p9 = pneg %p810_p5 }
  0x83   : > { %p817_p7 = por %p816_p2, %p815_p1 }
  0x84   : > { %611 = vmatpush3.bf16.msra.mxu0 %v710_v3 }
  0x85   : > { %612 = vmatprep.subr.bf16.mxu0 %v905_v0  ;;  %p818_p4 = pnand %p817_p7, %p811_p9 }
  0x88   : > { %613 = vmatpush3.bf16.msra.mxu0 %v711_v4 }
  0x89   : > { %614 = vmatprep.subr.bf16.mxu0 %v905_v0 }
  0x8c   : > { %615 = vmatpush3.bf16.msra.mxu0 %v712_v5 }
  0x8d   : > { %616 = vmatprep.subr.bf16.mxu0 %v905_v0 }
  0x90   : > { %617 = vmatpush3.bf16.msra.mxu0 %v713_v6 }
  0x91   : > { %618 = vmatprep.subr.bf16.mxu0 %v905_v0 }
  0x94   : > { %619 = vmatpush3.bf16.msra.mxu0 %v714_v7 }
  0x95   : > { %620 = vmatprep.subr.bf16.mxu0 %v905_v0 }
  0x98   : > { %621 = vmatpush3.bf16.msra.mxu0 %v715_v8 }
  0x9b   : > { %623 = vmatmul.mubr.bf16.vlgmr.msra.gmra.mrb[0].mxu0 %v304_v10 }
 0x16e   : > { %v410_v12 = vpop.f32.mrb[0].mxu0 }
 0x16f   : > { %v411_v13 = vadd.f32 %v583_v11, %v410_v12  ;;  %v624_v14 = vpop.f32.mrb[1].mxu0 }
 0x170   : > { %v413_v15 = vpop.f32.mrb[2].mxu0 }
 0x171   : > { %v592_v16 = vmul.f32 -1.442695, %v411_v13  ;;  %v625_v17 = vpop.f32.mrb[3].mxu0 }
 0x173   : > { %716 = vpow2.f32 %v592_v16 }
 0x17d   : > { %v717_v18 = vpop.eup %716 }
 0x17e   : > { %v419_v19 = vadd.f32 1.0, %v717_v18 }
 0x180   : > { %718 = vrcp.f32 %v419_v19 }
 0x18a   : > { %v719_v22 = vpop.eup %718 }
 0x18b   : > { %v424_v23 = vmul.f32 %v719_v22, %v423_v21 }
 0x18d   : > { %v425_v24 = vadd.f32 %v424_v23, %v303_v9 }
 0x18f   : > { %426 = vst [vmem:[%s298_s30] sm:$0xff] %v425_v24 }
 0x190   : > { %821 = shalt.err (!%p818_p4)
}
 0x191   : > { %s822_s10 = scalar_lea.hbm %s1142_s19, 128  ;;  %s826_s22 = scalar_lea.hbm %s1195_s4, 256 }
 0x192   : > { %p823_p8 = scmp.ne.s32.totalorder %s1142_s19, %s822_s10  ;;  %p827_p10 = scmp.lt.u32.totalorder %s1142_s19, %s1195_s4 }
 0x193   : > { %p828_p13 = scmp.lt.u32.totalorder %s826_s22, %s822_s10  ;;  %p830_p12 = scmp.lt.u32.totalorder %s822_s10, %s1142_s19 }
 0x194   : > { %p824_p11 = pnand %p823_p8, %p1218_p0 }
 0x195   : > { %p829_p3 = por %p828_p13, %p827_p10 }
 0x196   : > { %p825_p6 = pneg %p824_p11 }
 0x197   : > { %p831_p5 = por %p830_p12, %p829_p3 }
 0x199   : > { %p832_p9 = pnand %p831_p5, %p825_p6 }
 0x19b   : > { %835 = shalt.err (!%p832_p9)
}
 0x19c   : > { %634 = dma.vmem_to_hbm [thread:$0]  (%p1218_p0), %s1144_s27, 128, %s1142_s19, %s428_s6  }
 0x19d PF: > { %s454_s5 = sand.u32 1, %s878_s15   ;;  %p1219_p1 = scmp.ne.s32.totalorder %s1205_s24, 0 }
 0x19e   : > { %p1220_p2 = scmp.ge.s32.totalorder %s898_s20, 2  ;;  %s455_s21 = scalar_lea.sflag [#allocation4], %s454_s5 }
 0x1a0   : > { %p648_p7 = pnand %p1220_p2, %p1219_p1 }
 0x1a2   : > { %873 = dma.done.wait (!%p648_p7), %s455_s21, 128  }
 0x1a3   : > { %875 = vsyncadd (!%p648_p7), %s455_s21, 4294967168  ;;  %s23_s20 = sadd.s32 1, %s898_s20   ;;  %s1221_s18 = sld [smem:[#allocation13_spill]] }
 0x1a4   : > { %p20_p4 = scmp.ge.s32.totalorder %s23_s20, 4   ;;  %s1222_s19 = sld [smem:[#allocation14_spill]] }
 0x1a5   : > { %s1223_s15 = smov %s882_s16  ;;  %s1224_s16 = smov %s886_s17 }
 0x1a6   : > { %s1225_s17 = smov %s1036_s7  ;;  %22 = sbr.rel (!%p20_p4) target bundleno = 10 (0xa), region = 102 }
 0x1ad   :  { %460 = vsyncpa [#allocation3], 1 }
 0x1ae   :  { %462 = vsyncpa [#allocation3 + $0x1], 1 }
 0x1af   :  { %463 = vsyncpa [#allocation6], 1 }
 0x1b0   :  { %465 = vsyncpa [#allocation6 + $0x1], 1 }
 0x1b1   :  { %466 = vsyncpa [#allocation4], 1 }
 0x1b2   :  { %468 = vsyncpa [#allocation4 + $0x1], 1 }

// kernel: tpu_custom_call.1
= control target key start
LH: loop header
LB: loop body
LE: loop exit
PB: predicated region body
PF: predicated region fallthrough
CT: control target
= control target key end

     0   :  { %s1191_s0 = inlined_call_operand.hbm [shape: f32[16,128], index: 0, kind: input, shape index: {}]   ;;  %s1192_s1 = inlined_call_operand.hbm [shape: f32[16,128], index: 1, kind: input, shape index: {}]   ;;  %s1193_s2 = inlined_call_operand.hbm [shape: bf16[128,128], index: 2, kind: input, shape index: {}]   ;;  %s1194_s3 = inlined_call_operand.vmem [shape: f32[1,128], index: 3, kind: input, shape index: {}]   ;;  %s1195_s4 = inlined_call_operand.hbm [shape: f32[16,128], index: 4, kind: output, shape index: {}]  }
   0x1   :  { %1202 = sst [smem:[#allocation15_spill]] %s1193_s2 }
   0x2   :  { %9 = vsyncpa [#allocation3], 0 }
   0x3   :  { %11 = vsyncpa [#allocation3 + $0x1], 0 }
   0x4   :  { %12 = vsyncpa [#allocation6], 0 }
   0x5   :  { %14 = vsyncpa [#allocation6 + $0x1], 0 }
   0x6   :  { %15 = vsyncpa [#allocation4], 0 }
   0x7   :  { %17 = vsyncpa [#allocation4 + $0x1], 0  ;;  %s933_s15 = smov 0   ;;  %s935_s16 = smov 0  }
   0x8   :  { %s937_s17 = smov 0   ;;  %s939_s18 = smov 0  }
   0x9   :  { %s941_s19 = smov 0   ;;  %s943_s20 = smov 0  }
   0xa LB: > { %1203 = sst [smem:[#allocation13_spill]] %s894_s19  ;;  %s964_s21 = sadd.s32 4294967295, %s898_s20   ;;  %s898_s20 = sphi %s943_s20, %s23_s20   ;;  %s894_s19 = sphi %s941_s19, %s1222_s19   ;;  %s890_s18 = sphi %s939_s18, %s1221_s18   ;;  %s886_s17 = sphi %s937_s17, %s1225_s17   ;;  %s882_s16 = sphi %s935_s16, %s1224_s16   ;;  %s878_s15 = sphi %s933_s15, %s1223_s15  }
   0xb   : > { %s569_s22 = sadd.s32 4294967294, %s898_s20   ;;  %p55_p0 = scmp.ne.s32.totalorder %s882_s16, %s878_s15 }
   0xc   : > { %p1196_p1 = scmp.eq.s32.totalorder %s964_s21, 0  ;;  %p167_p3 = scmp.eq.s32.totalorder %s569_s22, 1 }
   0xd   : > { %p570_p5 = scmp.ge.s32.totalorder %s898_s20, 1  ;;  %p174_p7 = scmp.lt.s32.totalorder %s898_s20, 3 }
   0xe   : > { %p973_p4 = por %p1196_p1, %p55_p0  ;;  %p978_p6 = por %p167_p3, %p55_p0 }
   0xf   : > { %p983_p8 = pnand %p570_p5, %p174_p7  ;;  %s900_s26 = smov [#allocation7]  }
  0x10   : > { %s1204_s23 = scalar_select %p973_p4, 1, 0 }
  0x11   : > { %s1205_s24 = scalar_select %p978_p6, 1, 0 }
  0x12   : > { %s1206_s25 = scalar_select %p983_p8, 1, 0 }
  0x13   : > { %s188_s27 = sshll.u32 %s900_s26, 4  ;;  %p636_p9 = pneg %p983_p8  ;;  %s189_s27 = int_to_ptr.vmem [resolvable:$true] %s188_s27 }
  0x14   : > { %s35_s29 = sadd.s32 1, %s894_s19  ;;  %s1208_s2 = sld [smem:[#allocation15_spill]] }
  0x15   : > { %p992_p11 = pnand %p636_p9, %p1196_p1 }
  0x17   : > { %p722_p13 = pneg %p992_p11 }
  0x1a   : > { %s720_s6 = scalar_lea.hbm %s1208_s2, 1024 }
  0x1b   : > { %p721_p12 = scmp.ne.s32.totalorder %s1208_s2, %s720_s6  ;;  %p727_p5 = scmp.lt.u32.totalorder %s720_s6, %s1208_s2 }
  0x1d   : > { %p723_p0 = pnand %p722_p13, %p721_p12 }
  0x1f   : > { %p724_p3 = pneg %p723_p0 }
  0x21   : > { %p729_p7 = pnand %p727_p5, %p724_p3 }
  0x23   : > { %732 = shalt.err (!%p729_p7)
}
  0x24   : > { %s733_s11 = scalar_lea.vmem %s189_s27, 1024  ;;  %p741_p2 = scmp.lt.s32.totalorder %s189_s27, %s189_s27 }
  0x25   : > { %p734_p9 = scmp.ne.s32.totalorder %s189_s27, %s733_s11  ;;  %p742_p6 = scmp.lt.s32.totalorder %s733_s11, %s733_s11 }
  0x27   : > { %p736_p10 = pnand %p734_p9, %p722_p13  ;;  %p743_p4 = por %p742_p6, %p741_p2 }
  0x29   : > { %p737_p1 = pneg %p736_p10 }
  0x2b   : > { %p744_p8 = pnand %p743_p4, %p737_p1 }
  0x2d   : > { %747 = shalt.err (!%p744_p8)
}
  0x2e   : > { %s901_s12 = smov 64   ;;  %s902_s13 = smov 4  }
  0x2f   : > { %639 = dma.hbm_to_vmem [thread:$0]  (!%p992_p11), %s1208_s2, 1024, %s189_s27, [#allocation6], %s901_s12, %s901_s12, %s902_s13  }
  0x30   : > { %p37_p1 = scmp.ge.s32.totalorder %s35_s29, 2  ;;  %s42_s26 = sadd.s32 1, %s886_s17 }
  0x31   : > { %p49_p2 = scmp.ne.s32.totalorder %s886_s17, %s882_s16  ;;  %p50_p4 = scmp.eq.s32.totalorder %s898_s20, 0 }
  0x32   : > { %s1227_s29 = smov (%p37_p1, %s35_s29), 0  ;;  %p1211_p8 = scmp.eq.s32.totalorder %s964_s21, 1 }
  0x33   : > { %1209 = sst [smem:[#allocation14_spill]] %s1227_s29  ;;  %p1019_p6 = por %p50_p4, %p49_p2 }
  0x34   : > { %p1025_p10 = por %p1211_p8, %p49_p2  ;;  %s39_s5 = ssub.s32 %s894_s19, %s1227_s29 }
  0x35   : > { %p652_p11 = scmp.lt.s32.totalorder %s898_s20, 2  ;;  %p40_p12 = scmp.eq.s32.totalorder %s39_s5, 0 }
  0x36   : > { %s1212_s28 = scalar_select %p1025_p10, 1, 0 }
  0x37   : > { %s208_s27 = sand.u32 1, %s886_s17   ;;  %s575_s8 = sshll.u32 %s894_s19, 7 }
  0x38   : > { %s1033_s6 = sshll.u32 %s208_s27, 3  ;;  %s1042_s11 = scalar_lea.hbm %s1191_s0, %s575_s8 }
  0x39   : > { %s1036_s7 = scalar_select %p40_p12, %s886_s17, %s42_s26  }
  0x3a   : > { %s212_s12 = scalar_lea.vmem [#allocation2], %s1033_s6  ;;  %p1049_p13 = pnand %p652_p11, %p1019_p6 }
  0x3b   : > { %s219_s13 = sshll.u32 %s212_s12, 4  ;;  %s1056_s5 = scalar_lea.hbm %s1192_s1, %s575_s8  ;;  %s1045_s13 = int_to_ptr.vmem [resolvable:$true] %s219_s13 }
  0x3c   : > { %s226_s9 = sand.u32 1, %s898_s20   ;;  %s209_s10 = scalar_lea.sflag [#allocation3], %s208_s27 }
  0x3d   : > { %s748_s2 = scalar_lea.hbm %s1042_s11, 128  ;;  %p750_p3 = pneg %p1049_p13 }
  0x3e   : > { %p749_p0 = scmp.ne.s32.totalorder %s1042_s11, %s748_s2  ;;  %s753_s29 = scalar_lea.hbm %s1191_s0, 256 }
  0x3f   : > { %p754_p9 = scmp.lt.u32.totalorder %s1042_s11, %s1191_s0  ;;  %p755_p1 = scmp.lt.u32.totalorder %s753_s29, %s748_s2 }
  0x40   : > { %p751_p5 = pnand %p750_p3, %p749_p0  ;;  %p757_p4 = scmp.lt.u32.totalorder %s748_s2, %s1042_s11 }
  0x41   : > { %p756_p2 = por %p755_p1, %p754_p9 }
  0x42   : > { %p752_p7 = pneg %p751_p5 }
  0x43   : > { %p758_p6 = por %p757_p4, %p756_p2 }
  0x45   : > { %p759_p8 = pnand %p758_p6, %p752_p7 }
  0x47   : > { %762 = shalt.err (!%p759_p8)
}
  0x48   : > { %s763_s27 = scalar_lea.vmem %s1045_s13, 128  ;;  %s903_s8 = smov [#allocation2]  }
  0x49   : > { %p764_p11 = scmp.ne.s32.totalorder %s1045_s13, %s763_s27  ;;  %s768_s26 = sshll.u32 %s903_s8, 4  ;;  %s769_s26 = int_to_ptr.vmem [resolvable:$false] %s768_s26 }
  0x4a   : > { %s770_s19 = scalar_lea.vmem %s769_s26, 256  ;;  %p771_p5 = scmp.lt.s32.totalorder %s1045_s13, %s769_s26 }
  0x4b   : > { %p766_p12 = pnand %p764_p11, %p750_p3  ;;  %p772_p9 = scmp.lt.s32.totalorder %s770_s19, %s763_s27 }
  0x4d   : > { %p767_p0 = pneg %p766_p12  ;;  %p773_p1 = por %p772_p9, %p771_p5 }
  0x4f   : > { %p774_p2 = pnand %p773_p1, %p767_p0 }
  0x51   : > { %777 = shalt.err (!%p774_p2)
}
  0x52   : > { %643 = dma.hbm_to_vmem [thread:$0]  (!%p1049_p13), %s1042_s11, 128, %s1045_s13, %s209_s10  }
  0x53   : > { %s230_s2 = scalar_lea.vmem [#allocation5], %s1033_s6  ;;  %s227_s30 = scalar_lea.sflag [#allocation6], %s226_s9 }
  0x54   : > { %s238_s29 = sshll.u32 %s230_s2, 4  ;;  %s778_s12 = scalar_lea.hbm %s1056_s5, 128  ;;  %s239_s29 = int_to_ptr.vmem [resolvable:$true] %s238_s29 }
  0x55   : > { %p779_p7 = scmp.ne.s32.totalorder %s1056_s5, %s778_s12  ;;  %s783_s8 = scalar_lea.hbm %s1192_s1, 256 }
  0x56   : > { %p784_p8 = scmp.lt.u32.totalorder %s1056_s5, %s1192_s1  ;;  %p785_p11 = scmp.lt.u32.totalorder %s783_s8, %s778_s12 }
  0x57   : > { %p781_p4 = pnand %p779_p7, %p750_p3  ;;  %p787_p0 = scmp.lt.u32.totalorder %s778_s12, %s1056_s5 }
  0x58   : > { %p786_p12 = por %p785_p11, %p784_p8 }
  0x59   : > { %p782_p6 = pneg %p781_p4 }
  0x5a   : > { %p788_p5 = por %p787_p0, %p786_p12 }
  0x5c   : > { %p789_p9 = pnand %p788_p5, %p782_p6 }
  0x5e   : > { %792 = shalt.err (!%p789_p9)
}
  0x5f   : > { %s793_s6 = scalar_lea.vmem %s239_s29, 128  ;;  %s904_s11 = smov [#allocation5]  }
  0x60   : > { %p794_p1 = scmp.ne.s32.totalorder %s239_s29, %s793_s6  ;;  %s798_s13 = sshll.u32 %s904_s11, 4  ;;  %s799_s13 = int_to_ptr.vmem [resolvable:$false] %s798_s13 }
  0x61   : > { %s800_s9 = scalar_lea.vmem %s799_s13, 256  ;;  %p801_p4 = scmp.lt.s32.totalorder %s239_s29, %s799_s13 }
  0x62   : > { %p796_p2 = pnand %p794_p1, %p750_p3  ;;  %p802_p10 = scmp.lt.s32.totalorder %s800_s9, %s793_s6 }
  0x64   : > { %p797_p7 = pneg %p796_p2  ;;  %p803_p8 = por %p802_p10, %p801_p4 }
  0x66   : > { %p804_p11 = pnand %p803_p8, %p797_p7 }
  0x68   : > { %807 = shalt.err (!%p804_p11)
}
  0x69   : > { %646 = dma.hbm_to_vmem [thread:$0]  (!%p1049_p13), %s1056_s5, 128, %s239_s29, %s227_s30  }
  0x6a   : > { %p1214_p6 = scmp.ne.s32.totalorder %s1206_s25, 0 }
  0x6b   : > { %s1109_s10 = sand.u32 (!%p1214_p6), 1, %s882_s16   ;;  %p1215_p10 = scmp.ne.s32.totalorder (!%p1214_p6), %s1204_s23, 0 }
  0x6c   : > { %247 = sbr.rel (%p1214_p6) target bundleno = 413 (0x19d), region = 36  ;;  %s1112_s2 = sshll.u32 (!%p1214_p6), %s1109_s10, 3 }
  0x6d   : > { %s250_s12 = scalar_lea.sflag (!%p1214_p6), [#allocation3], %s1109_s10  ;;  %s253_s22 = scalar_lea.vmem (!%p1214_p6), [#allocation2], %s1112_s2 }
  0x73   : > { %861 = dma.done.wait (%p1215_p10), %s250_s12, 128  }
  0x74   : > { %863 = vsyncadd (%p1215_p10), %s250_s12, 4294967168  ;;  %s258_s25 = sand.u32 1, %s964_s21   ;;  %s262_s5 = scalar_lea.vmem [#allocation5], %s1112_s2 }
  0x75   : > { %s259_s14 = scalar_lea.sflag [#allocation6], %s258_s25 }
  0x76   : > { %865 = dma.done.wait (%p1215_p10), %s259_s14, 128  }
  0x77   : > { %867 = vsyncadd (%p1215_p10), %s259_s14, 4294967168  ;;  %p1216_p13 = scmp.eq.s32.totalorder %s964_s21, 0 }
  0x79   : > { %869 = dma.done.wait (%p1216_p13), [#allocation6], 1024   ;;  %p1217_p3 = pmov %p1216_p13 }
  0x7a   : > { %v905_v0 = vmov 0.0   ;;  %vm906_vm0 = vmmov 0   ;;  %v708_v1 = vld [vmem:[#allocation7] sm:$0xff]   ;;  %v709_v2 = vld [vmem:[#allocation7 + $0x8] sm:$0xff]   ;;  %v710_v3 = vld [vmem:[#allocation7 + $0x10] sm:$0xff]   ;;  %s594_s29 = sshll.u32 %s890_s18, 7 }
  0x7b   : > { %871 = vsyncadd (%p1217_p3), [#allocation6], 4294966272  ;;  %606 = vmatprep.subr.bf16.mxu0 %v905_v0  ;;  %622 = vmatprep.mubr.msk.bf16.mxu0 %vm906_vm0, %v905_v0  ;;  %v711_v4 = vld [vmem:[#allocation7 + $0x18] sm:$0xff]   ;;  %v712_v5 = vld [vmem:[#allocation7 + $0x20] sm:$0xff]   ;;  %s298_s30 = scalar_lea.vmem [#allocation8], %s1112_s2  ;;  %s1142_s19 = scalar_lea.hbm %s1195_s4, %s594_s29 }
  0x7c   : > { %607 = vmatpush3.bf16.msra.mxu0 %v708_v1  ;;  %v713_v6 = vld [vmem:[#allocation7 + $0x28] sm:$0xff]   ;;  %v714_v7 = vld [vmem:[#allocation7 + $0x30] sm:$0xff]   ;;  %v715_v8 = vld [vmem:[#allocation7 + $0x38] sm:$0xff]   ;;  %s442_s27 = sshll.u32 %s298_s30, 4  ;;  %s428_s6 = scalar_lea.sflag [#allocation4], %s1109_s10  ;;  %s1144_s27 = int_to_ptr.vmem [resolvable:$true] %s442_s27 }
  0x7d   : > { %608 = vmatprep.subr.bf16.mxu0 %v905_v0  ;;  %v303_v9 = vld [vmem:[%s253_s22] sm:$0xff]  ;;  %v422_v20 = vld [vmem:[%s262_s5] sm:$0xff]  ;;  %s808_s11 = scalar_lea.vmem %s1144_s27, 128  ;;  %p1218_p0 = scmp.ne.s32.totalorder %s1212_s28, 0 }
  0x7e   : > { %v304_v10 = vpack.c.bf16 %v303_v9, %v303_v9  ;;  %v583_v11 = vld [vmem:[%s1194_s3] ss:$0 sm:$0xff]  ;;  %v423_v21 = vsub.f32 %v422_v20, %v303_v9  ;;  %p809_p12 = scmp.ne.s32.totalorder %s1144_s27, %s808_s11  ;;  %s907_s18 = smov [#allocation8]  }
  0x7f   : > { %s812_s13 = sshll.u32 %s907_s18, 4  ;;  %s813_s13 = int_to_ptr.vmem [resolvable:$false] %s812_s13 }
  0x80   : > { %609 = vmatpush3.bf16.msra.mxu0 %v709_v2  ;;  %p810_p5 = pnand %p809_p12, %p1218_p0  ;;  %s814_s9 = scalar_lea.vmem %s813_s13, 256 }
  0x81   : > { %610 = vmatprep.subr.bf16.mxu0 %v905_v0  ;;  %p815_p1 = scmp.lt.s32.totalorder %s1144_s27, %s813_s13  ;;  %p816_p2 = scmp.lt.s32.totalorder %s814_s9, %s808_s11 }
  0x82   : > { %p811_p9 = pneg %p810_p5 }
  0x83   : > { %p817_p7 = por %p816_p2, %p815_p1 }
  0x84   : > { %611 = vmatpush3.bf16.msra.mxu0 %v710_v3 }
  0x85   : > { %612 = vmatprep.subr.bf16.mxu0 %v905_v0  ;;  %p818_p4 = pnand %p817_p7, %p811_p9 }
  0x88   : > { %613 = vmatpush3.bf16.msra.mxu0 %v711_v4 }
  0x89   : > { %614 = vmatprep.subr.bf16.mxu0 %v905_v0 }
  0x8c   : > { %615 = vmatpush3.bf16.msra.mxu0 %v712_v5 }
  0x8d   : > { %616 = vmatprep.subr.bf16.mxu0 %v905_v0 }
  0x90   : > { %617 = vmatpush3.bf16.msra.mxu0 %v713_v6 }
  0x91   : > { %618 = vmatprep.subr.bf16.mxu0 %v905_v0 }
  0x94   : > { %619 = vmatpush3.bf16.msra.mxu0 %v714_v7 }
  0x95   : > { %620 = vmatprep.subr.bf16.mxu0 %v905_v0 }
  0x98   : > { %621 = vmatpush3.bf16.msra.mxu0 %v715_v8 }
  0x9b   : > { %623 = vmatmul.mubr.bf16.vlgmr.msra.gmra.mrb[0].mxu0 %v304_v10 }
 0x16e   : > { %v410_v12 = vpop.f32.mrb[0].mxu0 }
 0x16f   : > { %v411_v13 = vadd.f32 %v583_v11, %v410_v12  ;;  %v624_v14 = vpop.f32.mrb[1].mxu0 }
 0x170   : > { %v413_v15 = vpop.f32.mrb[2].mxu0 }
 0x171   : > { %v592_v16 = vmul.f32 -1.442695, %v411_v13  ;;  %v625_v17 = vpop.f32.mrb[3].mxu0 }
 0x173   : > { %716 = vpow2.f32 %v592_v16 }
 0x17d   : > { %v717_v18 = vpop.eup %716 }
 0x17e   : > { %v419_v19 = vadd.f32 1.0, %v717_v18 }
 0x180   : > { %718 = vrcp.f32 %v419_v19 }
 0x18a   : > { %v719_v22 = vpop.eup %718 }
 0x18b   : > { %v424_v23 = vmul.f32 %v719_v22, %v423_v21 }
 0x18d   : > { %v425_v24 = vadd.f32 %v424_v23, %v303_v9 }
 0x18f   : > { %426 = vst [vmem:[%s298_s30] sm:$0xff] %v425_v24 }
 0x190   : > { %821 = shalt.err (!%p818_p4)
}
 0x191   : > { %s822_s10 = scalar_lea.hbm %s1142_s19, 128  ;;  %s826_s22 = scalar_lea.hbm %s1195_s4, 256 }
 0x192   : > { %p823_p8 = scmp.ne.s32.totalorder %s1142_s19, %s822_s10  ;;  %p827_p10 = scmp.lt.u32.totalorder %s1142_s19, %s1195_s4 }
 0x193   : > { %p828_p13 = scmp.lt.u32.totalorder %s826_s22, %s822_s10  ;;  %p830_p12 = scmp.lt.u32.totalorder %s822_s10, %s1142_s19 }
 0x194   : > { %p824_p11 = pnand %p823_p8, %p1218_p0 }
 0x195   : > { %p829_p3 = por %p828_p13, %p827_p10 }
 0x196   : > { %p825_p6 = pneg %p824_p11 }
 0x197   : > { %p831_p5 = por %p830_p12, %p829_p3 }
 0x199   : > { %p832_p9 = pnand %p831_p5, %p825_p6 }
 0x19b   : > { %835 = shalt.err (!%p832_p9)
}
 0x19c   : > { %634 = dma.vmem_to_hbm [thread:$0]  (%p1218_p0), %s1144_s27, 128, %s1142_s19, %s428_s6  }
 0x19d PF: > { %s454_s5 = sand.u32 1, %s878_s15   ;;  %p1219_p1 = scmp.ne.s32.totalorder %s1205_s24, 0 }
 0x19e   : > { %p1220_p2 = scmp.ge.s32.totalorder %s898_s20, 2  ;;  %s455_s21 = scalar_lea.sflag [#allocation4], %s454_s5 }
 0x1a0   : > { %p648_p7 = pnand %p1220_p2, %p1219_p1 }
 0x1a2   : > { %873 = dma.done.wait (!%p648_p7), %s455_s21, 128  }
 0x1a3   : > { %875 = vsyncadd (!%p648_p7), %s455_s21, 4294967168  ;;  %s23_s20 = sadd.s32 1, %s898_s20   ;;  %s1221_s18 = sld [smem:[#allocation13_spill]] }
 0x1a4   : > { %p20_p4 = scmp.ge.s32.totalorder %s23_s20, 4   ;;  %s1222_s19 = sld [smem:[#allocation14_spill]] }
 0x1a5   : > { %s1223_s15 = smov %s882_s16  ;;  %s1224_s16 = smov %s886_s17 }
 0x1a6   : > { %s1225_s17 = smov %s1036_s7  ;;  %22 = sbr.rel (!%p20_p4) target bundleno = 10 (0xa), region = 102 }
 0x1ad   :  { %460 = vsyncpa [#allocation3], 1 }
 0x1ae   :  { %462 = vsyncpa [#allocation3 + $0x1], 1 }
 0x1af   :  { %463 = vsyncpa [#allocation6], 1 }
 0x1b0   :  { %465 = vsyncpa [#allocation6 + $0x1], 1 }
 0x1b1   :  { %466 = vsyncpa [#allocation4], 1 }
 0x1b2   :  { %468 = vsyncpa [#allocation4 + $0x1], 1 }

</bundles_post_ra>
